<compile_context>
chip_gen: v5e
topology: v5e:2x2
jax: 0.10.0
libtpu: 0.0.40
codegen_flags: <defaults>
</compile_context>

<pallas_src>
import functools

import jax
import jax.numpy as jnp
from jax import lax
from jax.experimental import pallas as pl
from jax.experimental.pallas import tpu as pltpu


def _mlp_block_kernel(x_ref, w1_ref, w2_ref, a_ref, p_ref, o_ref, *, eps, wh, wd):
    """One lane-dense row tile: MLP -> residual -> LayerNorm, all in VMEM.

    x_ref : (tm_p, wd)   packed activations in native dtype, wd = group*D
    w1_ref: (wd, wh)     block-diag replicated W1, wh = group*H  (MXU dtype)
    w2_ref: (wh, wd)     block-diag replicated W2               (MXU dtype)
    a_ref : (wd, wd)     block-diag segment mask, pre-scaled by 1/D
    p_ref : (4, max(wh, wd)) packed b1 / b2 / gamma / beta (f32)
    """
    x = x_ref[...].astype(jnp.float32)                         # (tm_p, wd)

    b1 = p_ref[0:1, :wh]
    b2 = p_ref[1:2, :wd]
    g = p_ref[2:3, :wd]
    be = p_ref[3:4, :wd]

    # Linear1 + ReLU  (MXU dtype, f32 accumulate)
    h = jnp.dot(x.astype(w1_ref.dtype), w1_ref[...],
                preferred_element_type=jnp.float32) + b1
    h = jnp.maximum(h, 0.0)

    # Linear2
    o = jnp.dot(h.astype(w2_ref.dtype), w2_ref[...],
                preferred_element_type=jnp.float32) + b2

    # Residual + LayerNorm over each D-wide lane segment.
    # Centered two-pass stats; the block-diag mask is pre-scaled by 1/D so the
    # two matmuls directly give the per-segment mean and (biased) variance.
    # Segment sum-and-broadcast rides the MXU (no XLU cross-lane reduce).
    r = o + x
    mean = jnp.dot(r.astype(a_ref.dtype), a_ref[...],
                   preferred_element_type=jnp.float32)
    rc = r - mean
    var = jnp.dot((rc * rc).astype(a_ref.dtype), a_ref[...],
                  preferred_element_type=jnp.float32)
    y = rc * lax.rsqrt(var + eps)
    y = y * g + be

    # NOTE: rows belonging to a partial last grid block may hold garbage here;
    # Pallas masks the output DMA so they are never written back.
    # TODO(synk): nn.Dropout is identity in eval mode; training-mode dropout
    # (pltpu.prng_random_bits mask) is not implemented here.
    o_ref[...] = y.astype(o_ref.dtype)


def mlp_block(x, w1, b1, w2, b2, gamma, beta, *, eps=1e-5, tm_p=None,
              mxu_dtype=jnp.bfloat16):
    """x: (B, S, D); weights stored (in, out) i.e. transposed torch layout."""
    B, S, D = x.shape
    Din, H = w1.shape
    assert Din == D and w2.shape == (H, D)
    rows = B * S

    # ---- lane packing: pack `group` consecutive rows side-by-side so the
    # last dim of every DMA'd block is (ideally) 128 lanes wide.  group must
    # also divide rows so the packed reshape is a free view (no pad / slice).
    max_group = 128 // D if (D < 128 and 128 % D == 0) else 1
    group = max_group
    while group > 1 and rows % group != 0:
        group //= 2
    wd, wh = group * D, group * H
    packed_rows = rows // group

    # ---- generation-aware tile target & VMEM ceiling --------------------------
    try:
        vmem_cap = int(pltpu.get_tpu_info().vmem_capacity_bytes)
    except Exception:
        vmem_cap = 64 << 20                      # conservative (v7x per-TC) fallback
    vmem_ceiling = max(16 << 20, min(vmem_cap - (8 << 20), 112 << 20))

    x_bytes = jnp.dtype(x.dtype).itemsize
    w_bytes = jnp.dtype(mxu_dtype).itemsize
    pw = max(wh, wd)
    sub = max(8, 32 // max(1, x_bytes))          # sublane alignment for input dtype

    if tm_p is None:
        # ~1-4 MB per pipelined block; bigger tile allowed on 128-MiB-VMEM parts.
        tm_p = 4096 if vmem_cap >= (96 << 20) else 2048
    # Keep >= ~8 grid steps when rows allow (pipelining + megacore), but never
    # drop below one sublane-aligned tile.
    tm_p = min(tm_p, max(sub, packed_rows // 8))
    tm_p = max(sub, (tm_p // sub) * sub)
    if packed_rows < tm_p:
        tm_p = packed_rows                       # single full-extent block

    def vmem_est(t):
        return (2 * (wd * wh * 2 + wd * wd) * w_bytes   # resident weights + LN mask (x2 buf)
                + 2 * 4 * pw * 4                        # packed bias/LN params
                + 2 * t * wd * (2 * x_bytes)            # double-buffered in/out row tiles
                + t * (wh + 8 * wd) * 4)                # in-kernel f32 temporaries

    while tm_p > sub and 2 * vmem_est(tm_p) > vmem_ceiling:
        tm_p = max(sub, (tm_p // 2) // sub * sub)
    vmem_limit = int(min(vmem_ceiling, max(16 << 20, 2 * vmem_est(tm_p))))

    grid = pl.cdiv(packed_rows, tm_p)            # last block may be partial (masked)

    # ---- operands (input stays in native dtype; packed reshape is free) -------
    x_pk = x.reshape(packed_rows, wd)

    bd = jax.scipy.linalg.block_diag
    w1_bd = bd(*([w1.astype(jnp.float32)] * group)).astype(mxu_dtype)         # (wd, wh)
    w2_bd = bd(*([w2.astype(jnp.float32)] * group)).astype(mxu_dtype)         # (wh, wd)
    a_bd = bd(*([jnp.full((D, D), 1.0 / D, jnp.float32)] * group)).astype(mxu_dtype)

    params = jnp.zeros((4, pw), jnp.float32)     # single packed broadcast operand
    params = params.at[0, :wh].set(jnp.tile(b1.astype(jnp.float32), group))
    params = params.at[1, :wd].set(jnp.tile(b2.astype(jnp.float32), group))
    params = params.at[2, :wd].set(jnp.tile(gamma.astype(jnp.float32), group))
    params = params.at[3, :wd].set(jnp.tile(beta.astype(jnp.float32), group))

    kernel = functools.partial(_mlp_block_kernel, eps=eps, wh=wh, wd=wd)

    out = pl.pallas_call(
        kernel,
        out_shape=jax.ShapeDtypeStruct((packed_rows, wd), x.dtype),
        grid_spec=pltpu.PrefetchScalarGridSpec(
            num_scalar_prefetch=0,
            grid=(grid,),
            in_specs=[
                pl.BlockSpec((tm_p, wd), lambda i: (i, 0)),   # packed X tile (pipelined)
                pl.BlockSpec((wd, wh), lambda i: (0, 0)),     # W1 (resident)
                pl.BlockSpec((wh, wd), lambda i: (0, 0)),     # W2 (resident)
                pl.BlockSpec((wd, wd), lambda i: (0, 0)),     # LN segment mask (resident)
                pl.BlockSpec((4, pw), lambda i: (0, 0)),      # packed b1/b2/gamma/beta
            ],
            out_specs=pl.BlockSpec((tm_p, wd), lambda i: (i, 0)),
        ),
        compiler_params=pltpu.CompilerParams(
            dimension_semantics=("parallel",),
            vmem_limit_bytes=vmem_limit),
    )(x_pk, w1_bd, w2_bd, a_bd, params)

    return out.reshape(B, S, D)                  # free unpack (group divides rows)


def _reference(x, w1, b1, w2, b2, gamma, beta, *, eps=1e-5, mxu_dtype=jnp.bfloat16):
    """Matches the kernel's precision policy: bf16 matmuls, f32 residual+LN."""
    xc = x.astype(mxu_dtype)
    h = jnp.dot(xc, w1.astype(mxu_dtype), preferred_element_type=jnp.float32) + b1
    h = jnp.maximum(h, 0.0)
    o = jnp.dot(h.astype(mxu_dtype), w2.astype(mxu_dtype),
                preferred_element_type=jnp.float32) + b2
    r = o + x.astype(jnp.float32)
    mean = jnp.mean(r, axis=-1, keepdims=True)
    var = jnp.mean((r - mean) ** 2, axis=-1, keepdims=True)
    return ((r - mean) * lax.rsqrt(var + eps) * gamma + beta).astype(x.dtype)


if __name__ == "__main__":
    # Module config: input_dim == embed_dim == 32, mlp_embed_factor = 2,
    # nonlin_func = ReLU, pdropout = 0.3 (inactive in eval).
    D, F = 32, 2
    H = D * F

    key = jax.random.PRNGKey(0)
    kx, k1, kb1, k2, kb2, kx2, kx3 = jax.random.split(key, 7)

    # Weights stored as (in, out), i.e. transposed torch layout.
    w1 = jax.random.normal(k1, (D, H), jnp.float32) * (1.0 / jnp.sqrt(D))
    b1 = jax.random.normal(kb1, (H,), jnp.float32) * 0.01
    w2 = jax.random.normal(k2, (H, D), jnp.float32) * (1.0 / jnp.sqrt(H))
    b2 = jax.random.normal(kb2, (D,), jnp.float32) * 0.01
    gamma = jnp.ones((D,), jnp.float32)   # nn.LayerNorm default init
    beta = jnp.zeros((D,), jnp.float32)

    # Case 1: f32 input, multiple grid programs (pipeline + megacore path).
    B, S = 2, 64
    x = jax.random.normal(kx, (B, S, D), jnp.float32)
    y = jax.block_until_ready(mlp_block(x, w1, b1, w2, b2, gamma, beta))
    y_ref = _reference(x, w1, b1, w2, b2, gamma, beta)
    assert y.shape == (B, S, D)
    assert jnp.allclose(y, y_ref, atol=1e-2, rtol=1e-2), "case 1 mismatch vs reference"

    # Case 2: rows not divisible by 128//D nor by the row tile -> reduced lane
    # group + partial (masked) last grid block; no wrapper pad / slice.
    B2, S2 = 2, 9
    x_t = jax.random.normal(kx2, (B2, S2, D), jnp.float32)
    y_t = jax.block_until_ready(mlp_block(x_t, w1, b1, w2, b2, gamma, beta))
    y_t_ref = _reference(x_t, w1, b1, w2, b2, gamma, beta)
    assert y_t.shape == (B2, S2, D)
    assert jnp.allclose(y_t, y_t_ref, atol=1e-2, rtol=1e-2), "case 2 mismatch vs reference"

    # Case 3: bf16 input -> native-dtype DMA in AND out (halved HBM traffic).
    x_b = jax.random.normal(kx3, (B, S, D), jnp.float32).astype(jnp.bfloat16)
    y_b = jax.block_until_ready(mlp_block(x_b, w1, b1, w2, b2, gamma, beta))
    y_b_ref = _reference(x_b, w1, b1, w2, b2, gamma, beta)
    assert y_b.dtype == jnp.bfloat16 and y_b.shape == (B, S, D)
    assert jnp.allclose(y_b.astype(jnp.float32), y_b_ref.astype(jnp.float32),
                        atol=5e-2, rtol=5e-2), "case 3 mismatch vs reference"

    print("KERNEL_OK")
</pallas_src>

<mosaic_0001>
module attributes {stable_mosaic.version = 11 : i64} {
  func.func @_mlp_block_kernel(%arg0: i32, %arg1: memref<8x128xf32, #tpu.memory_space<vmem>>, %arg2: memref<128x256xbf16, #tpu.memory_space<vmem>>, %arg3: memref<256x128xbf16, #tpu.memory_space<vmem>>, %arg4: memref<128x128xbf16, #tpu.memory_space<vmem>>, %arg5: memref<4x256xf32, #tpu.memory_space<vmem>>, %arg6: memref<8x128xf32, #tpu.memory_space<vmem>>) attributes {dimension_semantics = [#tpu.dimension_semantics<parallel>], iteration_bounds = array<i64: 4>, scalar_prefetch = 0 : i64, scratch_operands = 0 : i64, tpu.core_type = #tpu.core_type<tc>, window_params = [{transform_indices = @transform_0, window_bounds = array<i64: 8, 128>}, {pipeline_mode = #tpu.pipeline_mode<synchronous>, transform_indices = @transform_1, window_bounds = array<i64: 128, 256>}, {pipeline_mode = #tpu.pipeline_mode<synchronous>, transform_indices = @transform_2, window_bounds = array<i64: 256, 128>}, {pipeline_mode = #tpu.pipeline_mode<synchronous>, transform_indices = @transform_3, window_bounds = array<i64: 128, 128>}, {pipeline_mode = #tpu.pipeline_mode<synchronous>, transform_indices = @transform_4, window_bounds = array<i64: 4, 256>}, {transform_indices = @transform_5, window_bounds = array<i64: 8, 128>}]} {
    %c0 = arith.constant 0 : index
    %c0_0 = arith.constant 0 : index
    %0 = vector.load %arg1[%c0, %c0_0] : memref<8x128xf32, #tpu.memory_space<vmem>>, vector<8x128xf32>
    %c0_1 = arith.constant 0 : index
    %c0_2 = arith.constant 0 : index
    %1 = vector.load %arg5[%c0_1, %c0_2] : memref<4x256xf32, #tpu.memory_space<vmem>>, vector<1x256xf32>
    %c1 = arith.constant 1 : index
    %c0_3 = arith.constant 0 : index
    %2 = vector.load %arg5[%c1, %c0_3] : memref<4x256xf32, #tpu.memory_space<vmem>>, vector<1x128xf32>
    %c2 = arith.constant 2 : index
    %c0_4 = arith.constant 0 : index
    %3 = vector.load %arg5[%c2, %c0_4] : memref<4x256xf32, #tpu.memory_space<vmem>>, vector<1x128xf32>
    %c3 = arith.constant 3 : index
    %c0_5 = arith.constant 0 : index
    %4 = vector.load %arg5[%c3, %c0_5] : memref<4x256xf32, #tpu.memory_space<vmem>>, vector<1x128xf32>
    %5 = arith.truncf %0 : vector<8x128xf32> to vector<8x128xbf16>
    %c0_6 = arith.constant 0 : index
    %c0_7 = arith.constant 0 : index
    %6 = vector.load %arg2[%c0_6, %c0_7] : memref<128x256xbf16, #tpu.memory_space<vmem>>, vector<128x256xbf16>
    %cst = arith.constant dense<0.000000e+00> : vector<8x256xf32>
    %7 = tpu.matmul %5, %6, %cst {dimension_numbers = #tpu.dot_dimension_numbers<[1], [0], [0], [1], [0, 0, 1, 1], [], []>} : vector<8x128xbf16>, vector<128x256xbf16>, vector<8x256xf32> -> vector<8x256xf32>
    %8 = vector.broadcast %1 : vector<1x256xf32> to vector<8x256xf32>
    %9 = arith.addf %7, %8 : vector<8x256xf32>
    %cst_8 = arith.constant 0.000000e+00 : f32
    %10 = vector.broadcast %cst_8 : f32 to vector<8x256xf32>
    %11 = arith.maximumf %9, %10 : vector<8x256xf32>
    %12 = arith.truncf %11 : vector<8x256xf32> to vector<8x256xbf16>
    %c0_9 = arith.constant 0 : index
    %c0_10 = arith.constant 0 : index
    %13 = vector.load %arg3[%c0_9, %c0_10] : memref<256x128xbf16, #tpu.memory_space<vmem>>, vector<256x128xbf16>
    %cst_11 = arith.constant dense<0.000000e+00> : vector<8x128xf32>
    %14 = tpu.matmul %12, %13, %cst_11 {dimension_numbers = #tpu.dot_dimension_numbers<[1], [0], [0], [1], [0, 0, 1, 1], [], []>} : vector<8x256xbf16>, vector<256x128xbf16>, vector<8x128xf32> -> vector<8x128xf32>
    %15 = vector.broadcast %2 : vector<1x128xf32> to vector<8x128xf32>
    %16 = arith.addf %14, %15 : vector<8x128xf32>
    %17 = arith.addf %16, %0 : vector<8x128xf32>
    %18 = arith.truncf %17 : vector<8x128xf32> to vector<8x128xbf16>
    %c0_12 = arith.constant 0 : index
    %c0_13 = arith.constant 0 : index
    %19 = vector.load %arg4[%c0_12, %c0_13] : memref<128x128xbf16, #tpu.memory_space<vmem>>, vector<128x128xbf16>
    %cst_14 = arith.constant dense<0.000000e+00> : vector<8x128xf32>
    %20 = tpu.matmul %18, %19, %cst_14 {dimension_numbers = #tpu.dot_dimension_numbers<[1], [0], [0], [1], [0, 0, 1, 1], [], []>} : vector<8x128xbf16>, vector<128x128xbf16>, vector<8x128xf32> -> vector<8x128xf32>
    %21 = arith.subf %17, %20 : vector<8x128xf32>
    %22 = arith.mulf %21, %21 : vector<8x128xf32>
    %23 = arith.truncf %22 : vector<8x128xf32> to vector<8x128xbf16>
    %c0_15 = arith.constant 0 : index
    %c0_16 = arith.constant 0 : index
    %24 = vector.load %arg4[%c0_15, %c0_16] : memref<128x128xbf16, #tpu.memory_space<vmem>>, vector<128x128xbf16>
    %cst_17 = arith.constant dense<0.000000e+00> : vector<8x128xf32>
    %25 = tpu.matmul %23, %24, %cst_17 {dimension_numbers = #tpu.dot_dimension_numbers<[1], [0], [0], [1], [0, 0, 1, 1], [], []>} : vector<8x128xbf16>, vector<128x128xbf16>, vector<8x128xf32> -> vector<8x128xf32>
    %cst_18 = arith.constant 9.99999974E-6 : f32
    %26 = vector.broadcast %cst_18 : f32 to vector<8x128xf32>
    %27 = arith.addf %25, %26 : vector<8x128xf32>
    %28 = math.rsqrt %27 : vector<8x128xf32>
    %29 = arith.mulf %21, %28 : vector<8x128xf32>
    %30 = vector.broadcast %3 : vector<1x128xf32> to vector<8x128xf32>
    %31 = arith.mulf %29, %30 : vector<8x128xf32>
    %32 = vector.broadcast %4 : vector<1x128xf32> to vector<8x128xf32>
    %33 = arith.addf %31, %32 : vector<8x128xf32>
    %c0_19 = arith.constant 0 : index
    %c0_20 = arith.constant 0 : index
    %34 = vector.load %arg6[%c0_19, %c0_20] : memref<8x128xf32, #tpu.memory_space<vmem>>, vector<8x128xf32>
    tpu.vector_store %arg6[%c0_19, %c0_20], %33 {strides = array<i32>} : memref<8x128xf32, #tpu.memory_space<vmem>>, vector<8x128xf32>,
    return
  }
  func.func @transform_0(%arg0: i32) -> (i32, i32) {
    %c0_i32 = arith.constant 0 : i32
    %c0_i32_0 = arith.constant 0 : i32
    return %arg0, %c0_i32 : i32, i32
  }
  func.func @transform_1(%arg0: i32) -> (i32, i32) {
    %c0_i32 = arith.constant 0 : i32
    %c0_i32_0 = arith.constant 0 : i32
    %c0_i32_1 = arith.constant 0 : i32
    return %c0_i32, %c0_i32_0 : i32, i32
  }
  func.func @transform_2(%arg0: i32) -> (i32, i32) {
    %c0_i32 = arith.constant 0 : i32
    %c0_i32_0 = arith.constant 0 : i32
    %c0_i32_1 = arith.constant 0 : i32
    return %c0_i32, %c0_i32_0 : i32, i32
  }
  func.func @transform_3(%arg0: i32) -> (i32, i32) {
    %c0_i32 = arith.constant 0 : i32
    %c0_i32_0 = arith.constant 0 : i32
    %c0_i32_1 = arith.constant 0 : i32
    return %c0_i32, %c0_i32_0 : i32, i32
  }
  func.func @transform_4(%arg0: i32) -> (i32, i32) {
    %c0_i32 = arith.constant 0 : i32
    %c0_i32_0 = arith.constant 0 : i32
    %c0_i32_1 = arith.constant 0 : i32
    return %c0_i32, %c0_i32_0 : i32, i32
  }
  func.func @transform_5(%arg0: i32) -> (i32, i32) {
    %c0_i32 = arith.constant 0 : i32
    %c0_i32_0 = arith.constant 0 : i32
    return %arg0, %c0_i32 : i32, i32
  }
}

</mosaic_0001>

<bundles_post_ra>
// kernel: tpu_custom_call.1
= control target key start
LH: loop header
LB: loop body
LE: loop exit
PB: predicated region body
PF: predicated region fallthrough
CT: control target
= control target key end

     0   :  { %10 = vsyncpa [#allocation3], 0  ;;  %s1590_s0 = inlined_call_operand.hbm [shape: f32[32,128], index: 0, kind: input, shape index: {}]   ;;  %s1591_s1 = inlined_call_operand.hbm [shape: bf16[128,256], index: 1, kind: input, shape index: {}]   ;;  %s1592_s2 = inlined_call_operand.hbm [shape: bf16[256,128], index: 2, kind: input, shape index: {}]   ;;  %s1593_s3 = inlined_call_operand.hbm [shape: bf16[128,128], index: 3, kind: input, shape index: {}]   ;;  %s1594_s4 = inlined_call_operand.hbm [shape: f32[4,256], index: 4, kind: input, shape index: {}]   ;;  %s1595_s5 = inlined_call_operand.hbm [shape: f32[32,128], index: 5, kind: output, shape index: {}]  }
   0x1   :  { %12 = vsyncpa [#allocation3 + $0x1], 0 }
   0x2   :  { %13 = vsyncpa [#allocation6], 0 }
   0x3   :  { %14 = vsyncpa [#allocation9], 0 }
   0x4   :  { %15 = vsyncpa [#allocation4], 0 }
   0x5   :  { %17 = vsyncpa [#allocation4 + $0x1], 0  ;;  %s1413_s18 = smov 0   ;;  %s1415_s19 = smov 0  }
   0x6   :  { %s1417_s20 = smov 0   ;;  %s1419_s21 = smov 0  }
   0x7 LB: > { %s175_s24 = sshll.u32 %s1591_s1, 4  ;;  %s1437_s25 = sadd.s32 4294967295, %s1373_s21   ;;  %s1373_s21 = sphi %s1419_s21, %s1606_s21   ;;  %s1369_s20 = sphi %s1417_s20, %s1605_s20   ;;  %s1365_s19 = sphi %s1415_s19, %s1604_s19   ;;  %s1361_s18 = sphi %s1413_s18, %s1603_s18   ;;  %s176_s24 = int_to_ptr.hbm [resolvable:$true] %s175_s24 }
   0x8   : > { %p834_p0 = scmp.ge.s32.totalorder %s1373_s21, 1  ;;  %p44_p1 = scmp.eq.s32.totalorder %s1437_s25, 0 }
   0x9   : > { %p164_p2 = scmp.lt.s32.totalorder %s1373_s21, 5  ;;  %s1375_s27 = smov [#allocation5]  }
   0xa   : > { %s177_s28 = sshll.u32 %s1375_s27, 4  ;;  %s203_s7 = sshll.u32 %s1593_s3, 4  ;;  %s178_s28 = int_to_ptr.vmem [resolvable:$true] %s177_s28  ;;  %s204_s7 = int_to_ptr.hbm [resolvable:$true] %s203_s7 }
   0xb   : > { %p1442_p3 = pnand %p834_p0, %p164_p2  ;;  %s1376_s8 = smov 128  }
   0xc   : > { %s1377_s9 = smov 8   ;;  %s1378_s10 = smov [#allocation8]  }
   0xd   : > { %p1073_p4 = pneg %p1442_p3  ;;  %s205_s11 = sshll.u32 %s1378_s10, 4  ;;  %s206_s11 = int_to_ptr.vmem [resolvable:$true] %s205_s11 }
   0xe   : > { %s189_s14 = sshll.u32 %s1592_s2, 4  ;;  %s1379_s15 = smov 64   ;;  %s190_s14 = int_to_ptr.hbm [resolvable:$true] %s189_s14 }
   0xf   : > { %p1450_p5 = pnand %p1073_p4, %p44_p1  ;;  %s1380_s16 = smov 4  }
  0x10   : > { %s218_s23 = sshll.u32 %s1594_s4, 4  ;;  %s833_s6 = sadd.s32 4294967294, %s1373_s21   ;;  %s219_s23 = int_to_ptr.hbm [resolvable:$true] %s218_s23 }
  0x11   : > { %1076 = dma.hbm_to_vmem [thread:$0]  (!%p1450_p5), %s176_s24, 2048, %s178_s28, [#allocation6], %s1376_s8, %s1376_s8, %s1377_s9  }
  0x12   : > { %1082 = dma.hbm_to_vmem [thread:$0]  (!%p1450_p5), %s204_s7, 1024, %s206_s11, [#allocation9], %s1379_s15, %s1379_s15, %s1380_s16  }
  0x13   : > { %s1381_s24 = smov [#allocation7]   ;;  %s1382_s28 = smov [#allocation10]  }
  0x14   : > { %s191_s27 = sshll.u32 %s1381_s24, 4  ;;  %s220_s30 = sshll.u32 %s1382_s28, 4  ;;  %s192_s27 = int_to_ptr.vmem [resolvable:$true] %s191_s27  ;;  %s221_s30 = int_to_ptr.vmem [resolvable:$true] %s220_s30 }
  0x15   : > { %1079 = dma.hbm_to_vmem [thread:$0]  (!%p1450_p5), %s190_s14, 2048, %s192_s27, [#allocation6], %s1379_s15, %s1379_s15, %s1380_s16  }
  0x16   : > { %1085 = dma.hbm_to_vmem [thread:$0]  (!%p1450_p5), %s219_s23, 128, %s221_s30, [#allocation9]  }
  0x17   : > { %s1473_s7 = sadd.s32 1, %s1373_s21   ;;  %s30_s9 = sadd.s32 1, %s1369_s20 }
  0x18   : > { %s27_s8 = ssub.s32 %s1373_s21, %s1473_s7  ;;  %p37_p7 = scmp.ne.s32.totalorder %s1369_s20, %s1365_s19 }
  0x19   : > { %p28_p6 = scmp.eq.s32.totalorder %s27_s8, 0  ;;  %p38_p8 = scmp.eq.s32.totalorder %s1373_s21, 0 }
  0x1a   : > { %p43_p9 = scmp.ne.s32.totalorder %s1365_s19, %s1361_s18  ;;  %p151_p12 = scmp.eq.s32.totalorder %s1437_s25, 3 }
  0x1b   : > { %s1484_s10 = scalar_select %p28_p6, %s1369_s20, %s30_s9  }
  0x1c   : > { %p1486_p10 = por %p38_p8, %p37_p7  ;;  %p1492_p11 = por %p44_p1, %p43_p9 }
  0x1d   : > { %p157_p13 = scmp.eq.s32.totalorder %s833_s6, 3  ;;  %p1098_p0 = scmp.lt.s32.totalorder %s1373_s21, 4 }
  0x1e   : > { %s231_s12 = sand.u32 1, %s1369_s20   ;;  %p1499_p2 = por %p151_p12, %p37_p7 }
  0x1f   : > { %p1503_p4 = por %p157_p13, %p43_p9  ;;  %s840_s15 = sshll.u32 %s231_s12, 3 }
  0x20   : > { %s841_s16 = sshll.u32 %s1373_s21, 3  ;;  %s235_s24 = scalar_lea.vmem [#allocation2], %s840_s15 }
  0x21   : > { %s239_s23 = scalar_lea.hbm %s1590_s0, %s841_s16  ;;  %s243_s27 = sshll.u32 %s235_s24, 4  ;;  %s244_s27 = int_to_ptr.vmem [resolvable:$true] %s243_s27 }
  0x22   : > { %s241_s28 = sshll.u32 %s239_s23, 4  ;;  %p1513_p5 = pnand %p1098_p0, %p1486_p10  ;;  %s242_s28 = int_to_ptr.hbm [resolvable:$true] %s241_s28 }
  0x23   : > { %s232_s6 = scalar_lea.sflag [#allocation3], %s231_s12  ;;  %s1269_s8 = sshra.s32 %s242_s28, 4  ;;  %s1270_s8 = int_to_ptr.hbm [resolvable:$true] %s1269_s8 }
  0x24   : > { %s1271_s9 = scalar_lea.hbm %s1270_s8, 8  ;;  %p1273_p7 = pneg %p1513_p5 }
  0x25   : > { %p1272_p6 = scmp.ne.s32.totalorder %s1270_s8, %s1271_s9  ;;  %s1276_s17 = scalar_lea.hbm %s1590_s0, 32 }
  0x26   : > { %p1277_p10 = scmp.lt.s32.totalorder %s1270_s8, %s1590_s0  ;;  %p1278_p12 = scmp.lt.s32.totalorder %s1276_s17, %s1271_s9 }
  0x27   : > { %p1274_p8 = pnand %p1273_p7, %p1272_p6 }
  0x28   : > { %p1279_p13 = por %p1278_p12, %p1277_p10 }
  0x29   : > { %p1275_p9 = pneg %p1274_p8 }
  0x2b   : > { %p1280_p0 = pnand %p1279_p13, %p1275_p9 }
  0x2d   : > { %1283 = shalt.err (!%p1280_p0)
}
  0x2e   : > { %1089 = dma.hbm_to_vmem [thread:$0]  (!%p1513_p5), %s242_s28, 128, %s244_s27, %s232_s6  }
  0x2f   : > { %252 = sbr.rel (%p1442_p3) target bundleno = 650 (0x28a), region = 40  ;;  %s1530_s12 = sand.u32 (!%p1442_p3), 1, %s1365_s19  }
  0x30   : > { %s843_s23 = sshll.u32 (!%p1442_p3), %s1530_s12, 3  ;;  %s255_s24 = scalar_lea.sflag (!%p1442_p3), [#allocation3], %s1530_s12 }
  0x31   : > { %s1536_s8 = scalar_lea.vmem (!%p1442_p3), [#allocation2], %s843_s23 }
  0x34   : > { %1344 = dma.done.wait (%p1492_p11), %s255_s24, 128  }
  0x35   : > { %1346 = vsyncadd (%p1492_p11), %s255_s24, 4294967168 }
  0x36   : > { %1348 = dma.done.wait (%p44_p1), [#allocation6], 4096  }
  0x37   : > { %1350 = vsyncadd (%p44_p1), [#allocation6], 4294963200 }
  0x38   : > { %1352 = dma.done.wait (%p44_p1), [#allocation9], 1152  }
  0x39   : > { %1354 = vsyncadd (%p44_p1), [#allocation9], 4294966144  ;;  %v907_v0 = vld [vmem:[#allocation5 + $0x70] sm:$0xf]  ;;  %v1028_v1 = vld [vmem:[#allocation5 + $0x74] sm:$0xf0] }
  0x3a   : > { %v1027_v2 = vld [vmem:[#allocation5 + $0x74] sm:$0xf]  ;;  %v908_v3 = vor.u32 %v1028_v1, %v907_v0  ;;  %v909_v4 = vld [vmem:[#allocation5 + $0x78] sm:$0xf0]  ;;  %v899_v5 = vld [vmem:[#allocation5 + $0x60] sm:$0xf] }
  0x3b   : > { %v1026_v6 = vld [vmem:[#allocation5 + $0x64] sm:$0xf0]  ;;  %v912_v7 = vor.u32 %v1027_v2, %v909_v4  ;;  %v1025_v8 = vld [vmem:[#allocation5 + $0x64] sm:$0xf]  ;;  %v901_v9 = vld [vmem:[#allocation5 + $0x68] sm:$0xf0] }
  0x3c   : > { %413 = vmatpush.bf16.msra.mxu0 %v908_v3  ;;  %v900_v10 = vor.u32 %v1026_v6, %v899_v5  ;;  %v904_v11 = vor.u32 %v1025_v8, %v901_v9  ;;  %v891_v12 = vld [vmem:[#allocation5 + $0x50] sm:$0xf]  ;;  %v1024_v13 = vld [vmem:[#allocation5 + $0x54] sm:$0xf0]  ;;  %v1023_v14 = vld [vmem:[#allocation5 + $0x54] sm:$0xf] }
  0x3d   : > { %426 = vmatpush.bf16.msra.mxu1 %v912_v7  ;;  %v893_v15 = vld [vmem:[#allocation5 + $0x58] sm:$0xf0]  ;;  %v892_v16 = vor.u32 %v1024_v13, %v891_v12  ;;  %v883_v18 = vld [vmem:[#allocation5 + $0x40] sm:$0xf]  ;;  %v1022_v19 = vld [vmem:[#allocation5 + $0x44] sm:$0xf0] }
  0x3e   : > { %v896_v17 = vor.u32 %v1023_v14, %v893_v15  ;;  %v1021_v20 = vld [vmem:[#allocation5 + $0x44] sm:$0xf]  ;;  %v885_v21 = vld [vmem:[#allocation5 + $0x48] sm:$0xf0]  ;;  %v884_v22 = vor.u32 %v1022_v19, %v883_v18  ;;  %v1036_v23 = vld [vmem:[#allocation7 + $0x38] sm:$0xff]  ;;  %s1010_s26 = sshll.u32 %s1437_s25, 3 }
  0x3f   : > { %v1044_v24 = vld [vmem:[#allocation7 + $0x78] sm:$0xff]  ;;  %v888_v25 = vor.u32 %v1021_v20, %v885_v21  ;;  %v875_v26 = vld [vmem:[#allocation5 + $0x30] sm:$0xf]  ;;  %v1019_v28 = vld [vmem:[#allocation5 + $0x34] sm:$0xf]  ;;  %572 = vmatpush.bf16.msra.mxu2 %v1036_v23  ;;  %s720_s28 = scalar_lea.hbm %s1595_s5, %s1010_s26  ;;  %s305_s30 = scalar_lea.vmem [#allocation11], %s843_s23 }
  0x40   : > { %414 = vmatpush.bf16.msra.mxu0 %v900_v10  ;;  %v1020_v27 = vld [vmem:[#allocation5 + $0x34] sm:$0xf0]  ;;  %v877_v29 = vld [vmem:[#allocation5 + $0x38] sm:$0xf0]  ;;  %585 = vmatpush.bf16.msra.mxu3 %v1044_v24  ;;  %v1035_v30 = vld [vmem:[#allocation7 + $0x30] sm:$0xff]  ;;  %s722_s6 = sshll.u32 %s305_s30, 4  ;;  %s723_s6 = int_to_ptr.vmem [resolvable:$true] %s722_s6 }
  0x41   : > { %427 = vmatpush.bf16.msra.mxu1 %v904_v11  ;;  %v1043_v31 = vld [vmem:[#allocation7 + $0x70] sm:$0xff]  ;;  %v876_v32 = vor.u32 %v1020_v27, %v875_v26  ;;  %v867_v33 = vld [vmem:[#allocation5 + $0x20] sm:$0xf]  ;;  %v1018_v34 = vld [vmem:[#allocation5 + $0x24] sm:$0xf0]  ;;  %v880_v35 = vor.u32 %v1019_v28, %v877_v29  ;;  %s724_s9 = sshll.u32 %s720_s28, 4  ;;  %s725_s9 = int_to_ptr.hbm [resolvable:$true] %s724_s9 }
  0x42   : > { %v1017_v36 = vld [vmem:[#allocation5 + $0x24] sm:$0xf]  ;;  %v869_v37 = vld [vmem:[#allocation5 + $0x28] sm:$0xf0]  ;;  %v868_v40 = vor.u32 %v1018_v34, %v867_v33  ;;  %v859_v42 = vld [vmem:[#allocation5 + $0x10] sm:$0xf] }
  0x43   : > { %573 = vmatpush.bf16.msra.mxu2 %v1035_v30  ;;  %v1034_v38 = vld [vmem:[#allocation7 + $0x28] sm:$0xff]  ;;  %v872_v41 = vor.u32 %v1017_v36, %v869_v37  ;;  %v1016_v43 = vld [vmem:[#allocation5 + $0x14] sm:$0xf0]  ;;  %v1015_v44 = vld [vmem:[#allocation5 + $0x14] sm:$0xf]  ;;  %s710_s25 = scalar_lea.sflag [#allocation4], %s1530_s12 }
  0x44   : > { %415 = vmatpush.bf16.msra.mxu0 %v892_v16  ;;  %586 = vmatpush.bf16.msra.mxu3 %v1043_v31  ;;  %v1042_v39 = vld [vmem:[#allocation7 + $0x68] sm:$0xff]  ;;  %v861_v45 = vld [vmem:[#allocation5 + $0x18] sm:$0xf0]  ;;  %v1033_v46 = vld [vmem:[#allocation7 + $0x20] sm:$0xff]  ;;  %v860_v48 = vor.u32 %v1016_v43, %v859_v42  ;;  %s1313_s15 = sshra.s32 %s725_s9, 4  ;;  %s1319_s11 = scalar_lea.hbm %s1595_s5, 32  ;;  %s1314_s15 = int_to_ptr.hbm [resolvable:$true] %s1313_s15 }
  0x45   : > { %428 = vmatpush.bf16.msra.mxu1 %v896_v17  ;;  %v1041_v47 = vld [vmem:[#allocation7 + $0x60] sm:$0xff]  ;;  %v864_v49 = vor.u32 %v1015_v44, %v861_v45  ;;  %v1014_v51 = vld [vmem:[#allocation5 + $0x4] sm:$0xf0]  ;;  %v853_v53 = vld [vmem:[#allocation5 + $0x8] sm:$0xf0]  ;;  %s1315_s16 = scalar_lea.hbm %s1314_s15, 8  ;;  %p1320_p5 = scmp.lt.s32.totalorder %s1314_s15, %s1595_s5 }
  0x46   : > { %v851_v50 = vld [vmem:[#allocation5] sm:$0xf]  ;;  %v1013_v52 = vld [vmem:[#allocation5 + $0x4] sm:$0xf]  ;;  %v1032_v54 = vld [vmem:[#allocation7 + $0x18] sm:$0xff]  ;;  %p1316_p1 = scmp.ne.s32.totalorder %s1314_s15, %s1315_s16  ;;  %p1321_p6 = scmp.lt.s32.totalorder %s1319_s11, %s1315_s16 }
  0x47   : > { %574 = vmatpush.bf16.msra.mxu2 %v1034_v38  ;;  %v1040_v55 = vld [vmem:[#allocation7 + $0x58] sm:$0xff]  ;;  %v852_v56 = vor.u32 %v1014_v51, %v851_v50  ;;  %v856_v58 = vor.u32 %v1013_v52, %v853_v53  ;;  %v1031_v59 = vld [vmem:[#allocation7 + $0x10] sm:$0xff]  ;;  %v1030_v62 = vld [vmem:[#allocation7 + $0x8] sm:$0xff] }
  0x48   : > { %416 = vmatpush.bf16.msra.mxu0 %v884_v22  ;;  %587 = vmatpush.bf16.msra.mxu3 %v1042_v39  ;;  %v1551_v57 = vld [vmem:[%s1536_s8] sm:$0xff]  ;;  %v1038_v63 = vld [vmem:[#allocation7 + $0x48] sm:$0xff]  ;;  %v1029_v0 = vld [vmem:[#allocation7] sm:$0xff]  ;;  %p1317_p3 = pnand %p1316_p1, %p1499_p2  ;;  %p1322_p7 = por %p1321_p6, %p1320_p5 }
  0x49   : > { %429 = vmatpush.bf16.msra.mxu1 %v888_v25  ;;  %v1039_v60 = vld [vmem:[#allocation7 + $0x50] sm:$0xff]  ;;  %v311_v61 = vpack.c.bf16 %v1551_v57, %v1551_v57  ;;  %v1037_v1 = vld [vmem:[#allocation7 + $0x40] sm:$0xff]  ;;  %v1052_v2 = vld [vmem:[#allocation8 + $0x38] sm:$0xff] }
  0x4a   : > { %v1051_v3 = vld [vmem:[#allocation8 + $0x30] sm:$0xff]  ;;  %v1050_v4 = vld [vmem:[#allocation8 + $0x28] sm:$0xff]  ;;  %v1049_v5 = vld [vmem:[#allocation8 + $0x20] sm:$0xff]  ;;  %p1318_p11 = pneg %p1317_p3 }
  0x4b   : > { %575 = vmatpush.bf16.msra.mxu2 %v1033_v46  ;;  %v1048_v6 = vld [vmem:[#allocation8 + $0x18] sm:$0xff]  ;;  %v307_v7 = vld [vmem:[#allocation10] ss:$4 sm:$0x3]  ;;  %v1047_v8 = vld [vmem:[#allocation8 + $0x10] sm:$0xff] }
  0x4c   : > { %417 = vmatpush.bf16.msra.mxu0 %v876_v32  ;;  %588 = vmatpush.bf16.msra.mxu3 %v1041_v47  ;;  %v329_v9 = vperm.slane %v307_v7, 0  ;;  %v330_v10 = vperm.slane %v307_v7, 1  ;;  %v1046_v21 = vld [vmem:[#allocation8 + $0x8] sm:$0xff]  ;;  %v1045_v22 = vld [vmem:[#allocation8] sm:$0xff]  ;;  %p1323_p8 = pnand %p1322_p7, %p1318_p11 }
  0x4d   : > { %430 = vmatpush.bf16.msra.mxu1 %v880_v35  ;;  %v1144_v23 = vld [vmem:[#allocation10 + $0x1] ss:$0 sm:$0xff]  ;;  %v1145_v46 = vld [vmem:[#allocation10 + $0x2] ss:$0 sm:$0xff] }
  0x4f   : > { %576 = vmatpush.bf16.msra.mxu2 %v1032_v54 }
  0x50   : > { %418 = vmatpush.bf16.msra.mxu0 %v868_v40  ;;  %589 = vmatpush.bf16.msra.mxu3 %v1040_v55 }
  0x51   : > { %431 = vmatpush.bf16.msra.mxu1 %v872_v41 }
  0x53   : > { %577 = vmatpush.bf16.msra.mxu2 %v1031_v59 }
  0x54   : > { %419 = vmatpush.bf16.msra.mxu0 %v860_v48  ;;  %590 = vmatpush.bf16.msra.mxu3 %v1039_v60 }
  0x55   : > { %432 = vmatpush.bf16.msra.mxu1 %v864_v49  ;;  %v1146_v49 = vld [vmem:[#allocation10 + $0x3] ss:$0 sm:$0xff] }
  0x57   : > { %578 = vmatpush.bf16.msra.mxu2 %v1030_v62 }
  0x58   : > { %420 = vmatpush.bf16.msra.mxu0 %v852_v56  ;;  %591 = vmatpush.bf16.msra.mxu3 %v1038_v63 }
  0x59   : > { %433 = vmatpush.bf16.msra.mxu1 %v856_v58 }
  0x5b   : > { %421 = vmatmul.bf16.vlgmr.msra.gmra.mxu0 %v311_v61  ;;  %579 = vmatpush.bf16.msra.mxu2 %v1029_v0 }
  0x5c   : > { %434 = vmatmul.bf16.vlgmr.msra.gmra.mxu1 %v311_v61  ;;  %592 = vmatpush.bf16.msra.mxu3 %v1037_v1 }
  0x5d   : > { %664 = vmatpush.bf16.msrb.mxu0 %v1052_v2  ;;  %680 = vmatpush.bf16.msrb.mxu1 %v1052_v2 }
  0x61   : > { %665 = vmatpush.bf16.msrb.mxu0 %v1051_v3  ;;  %681 = vmatpush.bf16.msrb.mxu1 %v1051_v3 }
  0x65   : > { %666 = vmatpush.bf16.msrb.mxu0 %v1050_v4  ;;  %682 = vmatpush.bf16.msrb.mxu1 %v1050_v4 }
  0x69   : > { %667 = vmatpush.bf16.msrb.mxu0 %v1049_v5  ;;  %683 = vmatpush.bf16.msrb.mxu1 %v1049_v5 }
  0x6d   : > { %668 = vmatpush.bf16.msrb.mxu0 %v1048_v6  ;;  %684 = vmatpush.bf16.msrb.mxu1 %v1048_v6 }
  0x71   : > { %669 = vmatpush.bf16.msrb.mxu0 %v1047_v8  ;;  %685 = vmatpush.bf16.msrb.mxu1 %v1047_v8 }
  0x75   : > { %670 = vmatpush.bf16.msrb.mxu0 %v1046_v21  ;;  %686 = vmatpush.bf16.msrb.mxu1 %v1046_v21 }
  0x79   : > { %671 = vmatpush.bf16.msrb.mxu0 %v1045_v22  ;;  %687 = vmatpush.bf16.msrb.mxu1 %v1045_v22 }
  0xd8   : > { %v422_v11 = vpop.f32.mrf.mxu0 }
  0xd9   : > { %v423_v12 = vadd.f32 %v422_v11, %v329_v9  ;;  %v435_v13 = vpop.f32.mrf.mxu1 }
  0xda   : > { %v436_v14 = vadd.f32 %v435_v13, %v330_v10 }
  0xdb   : > { %v439_v15 = vmax.f32 %v423_v12, 0.0 }
  0xdc   : > { %v440_v16 = vmax.f32 %v436_v14, 0.0 }
  0xdd   : > { %v441_v17 = vpack.c.bf16 %v439_v15, %v439_v15 }
  0xde   : > { %v442_v18 = vpack.c.bf16 %v440_v16, %v440_v16 }
  0xdf   : > { %580 = vmatmul.bf16.vlgmr.msra.gmra.mxu2 %v441_v17 }
  0xe0   : > { %593 = vmatmul.bf16.vlgmr.msra.gmra.mxu3 %v442_v18  ;;  %v424_v19 = vpop.f32.mrf.mxu0 }
  0xe1   : > { %v437_v20 = vpop.f32.mrf.mxu1 }
 0x162   : > { %v581_v24 = vpop.f32.mrf.mxu2 }
 0x163   : > { %v582_v25 = vadd.f32 %v1144_v23, %v581_v24  ;;  %v594_v26 = vpop.f32.mrf.mxu3 }
 0x165   : > { %v595_v27 = vadd.f32 %v594_v26, %v582_v25 }
 0x167   : > { %v598_v28 = vadd.f32 %v595_v27, %v1551_v57 }
 0x169   : > { %v599_v29 = vpack.c.bf16 %v598_v28, %v598_v28 }
 0x16a   : > { %v583_v30 = vpop.f32.mrf.mxu2 }
 0x16b   : > { %v596_v31 = vpop.f32.mrf.mxu3  ;;  %672 = vmatmul.bf16.vlgmr.msrb.gmra.mxu0 %v599_v29 }
 0x1e8   : > { %v673_v32 = vpop.f32.mrf.mxu0 }
 0x1e9   : > { %v677_v33 = vsub.f32 %v598_v28, %v673_v32 }
 0x1eb   : > { %v678_v34 = vmul.f32 %v677_v33, %v677_v33 }
 0x1ed   : > { %v679_v35 = vpack.c.bf16 %v678_v34, %v678_v34 }
 0x1ef   : > { %688 = vmatmul.bf16.vlgmr.msrb.gmra.mxu1 %v679_v35 }
 0x1f0   : > { %v675_v36 = vpop.f32.mrf.mxu0 }
 0x26c   : > { %v689_v37 = vpop.f32.mrf.mxu1 }
 0x26d   : > { %v690_v38 = vadd.f32 1e-05, %v689_v37 }
 0x26f   : > { %1147 = vrsqrt.f32 %v690_v38  ;;  %vm699_vm1 = vweird.f32 %v690_v38 }
 0x274   : > { %v691_v39 = vpop.f32.mrf.mxu1 }
 0x275   : > { %v1148_v40 = vpop.eup %1147 }
 0x276   : > { %v694_v41 = vmul.f32 %v1148_v40, %v690_v38  ;;  %vm700_vm0 = vweird.f32 %v1148_v40 }
 0x277   : > { %vm701_vm2 = vmor %vm699_vm1, %vm700_vm0 }
 0x278   : > { %v695_v42 = vmul.f32 %v1148_v40, %v694_v41 }
 0x27a   : > { %v696_v43 = vmul.f32 0.5, %v695_v42 }
 0x27c   : > { %v697_v44 = vsub.f32 1.5, %v696_v43 }
 0x27e   : > { %v698_v45 = vmul.f32 %v1148_v40, %v697_v44 }
 0x280   : > { %v702_v47 = vsel %vm701_vm2, %v1148_v40, %v698_v45 }
 0x281   : > { %v703_v48 = vmul.f32 %v702_v47, %v677_v33 }
 0x283   : > { %v705_v50 = vmul.f32 %v1145_v46, %v703_v48 }
 0x285   : > { %v707_v51 = vadd.f32 %v1146_v49, %v705_v50 }
 0x287   : > { %708 = vst [vmem:[%s305_s30] sm:$0xff] %v707_v51 }
 0x288   : > { %1326 = shalt.err (!%p1323_p8)
}
 0x289   : > { %1071 = dma.vmem_to_hbm [thread:$0]  (%p1499_p2), %s723_s6, 128, %s725_s9, %s710_s25  }
 0x28a PF: > { %p1103_p9 = scmp.ge.s32.totalorder %s1373_s21, 2  ;;  %s736_s12 = sand.u32 1, %s1361_s18  }
 0x28b   : > { %s737_s8 = scalar_lea.sflag [#allocation4], %s736_s12 }
 0x28c   : > { %p1091_p10 = pnand %p1103_p9, %p1503_p4 }
 0x28e   : > { %p1092_p12 = pneg %p1091_p10 }
 0x290   : > { %1356 = dma.done.wait (%p1092_p12), %s737_s8, 128  }
 0x291   : > { %1358 = vsyncadd (%p1092_p12), %s737_s8, 4294967168  ;;  %p20_p13 = scmp.ge.s32.totalorder %s1473_s7, 6   ;;  %s1603_s18 = smov %s1365_s19 }
 0x292   : > { %s1604_s19 = smov %s1369_s20  ;;  %s1605_s20 = smov %s1484_s10 }
 0x293   : > { %s1606_s21 = smov %s1473_s7  ;;  %22 = sbr.rel (!%p20_p13) target bundleno = 7 (0x7), region = 101 }
 0x298   :  { %743 = vsyncpa [#allocation3], 1 }
 0x299   :  { %745 = vsyncpa [#allocation3 + $0x1], 1 }
 0x29a   :  { %746 = vsyncpa [#allocation6], 1 }
 0x29b   :  { %747 = vsyncpa [#allocation9], 1 }
 0x29c   :  { %748 = vsyncpa [#allocation4], 1 }
 0x29d   :  { %750 = vsyncpa [#allocation4 + $0x1], 1 }

</bundles_post_ra>
